<compile_context>
chip_gen: v7x
topology: tpu7x:2x2x1
jax: 0.10.0
libtpu: 0.0.40
codegen_flags: <defaults>
</compile_context>

<pallas_src>
import math
from functools import partial

import jax
import jax.numpy as jnp
from jax.experimental import pallas as pl
from jax.experimental.pallas import tpu as pltpu


# ---------------------------------------------------------------------------
# Kernel 1: fused K/V projection  x @ [Wk^T | Wv^T] + [bk | bv]  -> bf16
# Runs once per token (previously recomputed once per query tile).
# ---------------------------------------------------------------------------
def _kv_proj_kernel(x_ref, wkv_ref, bkv_ref, o_ref):
    x = x_ref[0]                                                   # (TP, C) bf16
    kv = jax.lax.dot_general(x, wkv_ref[...], (((1,), (0,)), ((), ())),
                             preferred_element_type=jnp.float32)   # (TP, 2C) f32
    o_ref[0] = (kv + bkv_ref[...]).astype(o_ref.dtype)             # bf16


# ---------------------------------------------------------------------------
# Kernel 2: flash-style multi-head attention + fused output projection
# grid = (B, query tiles, kv tiles); online softmax in VMEM scratch.
# ---------------------------------------------------------------------------
def _attention_kernel(xq_ref, kv_ref, wq_ref, bq_ref, wp_ref, bp_ref, o_ref,
                      q_scratch, m_scratch, l_scratch, acc_scratch,
                      *, num_heads, seq_len, needs_mask):
    C = wq_ref.shape[0]            # wq is (Cin, Cout) = (C, C)
    hd = C // num_heads
    ki = pl.program_id(2)
    nk = pl.num_programs(2)

    # ---- init (first KV tile of this query tile): Q projection + stats reset ----
    @pl.when(ki == 0)
    def _init():
        xq = xq_ref[0]                                            # (TQ, C) bf16
        q = jax.lax.dot_general(xq, wq_ref[...], (((1,), (0,)), ((), ())),
                                preferred_element_type=jnp.float32)
        q_scratch[...] = (q + bq_ref[...]).astype(q_scratch.dtype)  # scale folded
        m_scratch[...] = jnp.full(m_scratch.shape, -jnp.inf, jnp.float32)
        l_scratch[...] = jnp.zeros(l_scratch.shape, jnp.float32)
        acc_scratch[...] = jnp.zeros(acc_scratch.shape, jnp.float32)

    kv = kv_ref[0]                                                # (TKV, 2C) bf16
    k = kv[:, :C]
    v = kv[:, C:]
    q = q_scratch[...]                                            # (TQ, C) bf16
    tkv = kv.shape[0]

    m_prev = m_scratch[...]                                       # (TQ, H) f32
    l_prev = l_scratch[...]                                       # (TQ, H) f32

    # Per-head online softmax.  Note: when hd < 128 the per-head S / P*V
    # contractions underfill the MXU; this is inherent to the module's head
    # layout — results are assembled into lane-dense (TQ, C) slabs so the
    # accumulator update / finalize projection stay full-width regardless.
    pv_parts, alpha_parts, m_cols, l_cols = [], [], [], []
    for h in range(num_heads):
        sl = slice(h * hd, (h + 1) * hd)
        s = jax.lax.dot_general(q[:, sl], k[:, sl], (((1,), (1,)), ((), ())),
                                preferred_element_type=jnp.float32)   # (TQ, TKV)
        if needs_mask:
            col = ki * tkv + jax.lax.broadcasted_iota(jnp.int32, s.shape, 1)
            s = jnp.where(col < seq_len, s, -jnp.inf)
        m_p = m_prev[:, h:h + 1]                                  # (TQ, 1)
        m_new = jnp.maximum(m_p, jnp.max(s, axis=-1, keepdims=True))
        alpha = jnp.exp(m_p - m_new)                              # f32 (v5e-safe)
        p = jnp.exp(s - m_new)                                    # (TQ, TKV) f32
        l_cols.append(alpha * l_prev[:, h:h + 1] + jnp.sum(p, axis=-1, keepdims=True))
        m_cols.append(m_new)
        alpha_parts.append(jnp.broadcast_to(alpha, (alpha.shape[0], hd)))
        pv_parts.append(jnp.dot(p.astype(jnp.bfloat16), v[:, sl],
                                preferred_element_type=jnp.float32))  # (TQ, hd)

    # Single lane-dense (TQ, C) accumulator update; heads packed along lanes.
    acc_scratch[...] = (jnp.concatenate(alpha_parts, axis=1) * acc_scratch[...]
                        + jnp.concatenate(pv_parts, axis=1))
    m_scratch[...] = jnp.concatenate(m_cols, axis=1)
    l_scratch[...] = jnp.concatenate(l_cols, axis=1)

    # ---- finalize (last KV tile): normalize + fused output projection ----
    @pl.when(ki == nk - 1)
    def _finalize():
        inv_l = pl.reciprocal(l_scratch[...], approx=True)        # (TQ, H)
        inv_full = jnp.concatenate(
            [jnp.broadcast_to(inv_l[:, h:h + 1], (inv_l.shape[0], hd))
             for h in range(num_heads)], axis=1)                  # (TQ, C)
        o = (acc_scratch[...] * inv_full).astype(jnp.bfloat16)    # (TQ, C)
        # One full-K (K = C) matmul instead of num_heads hd-contractions.
        out = jax.lax.dot_general(wp_ref[...], o, (((1,), (1,)), ((), ())),
                                  preferred_element_type=jnp.float32)  # (C, TQ)
        o_ref[0] = (out + bp_ref[...]).astype(o_ref.dtype)        # lane-dense


# ---------------------------------------------------------------------------
# Wrapper helpers
# ---------------------------------------------------------------------------
def _round_up(n, m):
    return ((n + m - 1) // m) * m


def _vmem_limit_bytes():
    cap = 64 * 1024 * 1024
    try:
        info = pltpu.get_tpu_info()
        cap = int(getattr(info, "vmem_capacity_bytes", cap)) or cap
    except Exception:
        pass
    # ~48 MiB on v7x (64 MiB / TensorCore), ~96 MiB on v5e/v6e (128 MiB).
    return min((cap * 3) // 4, 112 * 1024 * 1024)


def _vmem_estimate_bytes(tq, tkv, C, num_heads):
    bf16, f32 = 2, 4
    dbl = 2  # double-buffered pipeline blocks
    inputs = dbl * (tq * C * bf16            # x query tile
                    + tkv * 2 * C * bf16     # projected K/V tile
                    + 2 * C * C * bf16       # Wq, Wp
                    + 4 * C * f32)           # biases (rough)
    output = dbl * C * tq * f32
    scratch = tq * C * bf16 + 2 * tq * 128 * f32 + tq * C * f32
    transient = 4 * tq * tkv * f32 + 4 * tq * C * f32
    return inputs + output + scratch + transient


def _select_tiles(hw_pad, batch, C, num_heads, vmem_budget):
    q_cands = [c for c in (512, 256, 128) if hw_pad % c == 0] or [hw_pad]
    kv_cands = [c for c in (2048, 1024, 512, 256, 128) if hw_pad % c == 0] or [hw_pad]
    for tq in q_cands:
        # Keep >= 2 query tiles when B == 1 so both v7x TensorCores get work.
        if batch == 1 and hw_pad // tq < 2 and hw_pad > 128:
            continue
        for tkv in kv_cands:
            if _vmem_estimate_bytes(tq, tkv, C, num_heads) <= vmem_budget:
                return tq, tkv
    return q_cands[-1], kv_cands[-1]


def attention_forward(x_nchw, params, num_heads, *, tq=None, tkv=None,
                      out_dtype=jnp.float32):
    B, C, H, W = x_nchw.shape
    HW = H * W
    hd = C // num_heads
    scale = hd ** (-0.5)
    wq, bq, wk, bk, wv, bv, wp, bp = params

    vmem_limit = _vmem_limit_bytes()

    pad_unit = 128
    if tq is not None:
        pad_unit = math.lcm(pad_unit, tq)
    if tkv is not None:
        pad_unit = math.lcm(pad_unit, tkv)
    HW_pad = _round_up(HW, pad_unit)

    auto_tq, auto_tkv = _select_tiles(HW_pad, B, C, num_heads, vmem_limit // 2)
    tq = auto_tq if tq is None else tq
    tkv = auto_tkv if tkv is None else tkv
    nq = HW_pad // tq
    nk = HW_pad // tkv
    needs_mask = (HW_pad != HW)

    # NCHW -> token-major (B, HW_pad, C) bf16.  Single wrapper-side layout/cast
    # pass; padded tokens are zeros and are masked out of the softmax in-kernel.
    x_tok = jnp.transpose(x_nchw.reshape(B, C, HW), (0, 2, 1)).astype(jnp.bfloat16)
    if needs_mask:
        x_tok = jnp.pad(x_tok, ((0, 0), (0, HW_pad - HW), (0, 0)))

    w2 = lambda w: w.reshape(C, C)                       # conv weight (Cout, Cin)
    wq_t = (jnp.transpose(w2(wq)) * scale).astype(jnp.bfloat16)   # scale folded in
    bq_r = (bq * scale).reshape(1, C).astype(jnp.float32)
    wkv_t = jnp.concatenate([jnp.transpose(w2(wk)), jnp.transpose(w2(wv))],
                            axis=1).astype(jnp.bfloat16)          # (Cin, 2C)
    bkv_r = jnp.concatenate([bk, bv]).reshape(1, 2 * C).astype(jnp.float32)
    wp_o = w2(wp).astype(jnp.bfloat16)                            # (Cout, Cin)
    bp_c = bp.reshape(C, 1).astype(jnp.float32)

    # ---- pass 1: K/V projection, computed once per token ----
    kv = pl.pallas_call(
        _kv_proj_kernel,
        out_shape=jax.ShapeDtypeStruct((B, HW_pad, 2 * C), jnp.bfloat16),
        grid_spec=pltpu.PrefetchScalarGridSpec(
            num_scalar_prefetch=0,
            grid=(B, nk),
            in_specs=[
                pl.BlockSpec((1, tkv, C), lambda b, i: (b, i, 0)),
                pl.BlockSpec((C, 2 * C), lambda b, i: (0, 0)),
                pl.BlockSpec((1, 2 * C), lambda b, i: (0, 0)),
            ],
            out_specs=pl.BlockSpec((1, tkv, 2 * C), lambda b, i: (b, i, 0)),
        ),
        compiler_params=pltpu.CompilerParams(
            dimension_semantics=("parallel", "parallel"),
            vmem_limit_bytes=vmem_limit),
    )(x_tok, wkv_t, bkv_r)

    # ---- pass 2: flash attention + fused output projection ----
    kernel = partial(_attention_kernel, num_heads=num_heads, seq_len=HW,
                     needs_mask=needs_mask)
    const = lambda b, qi, ki: (0, 0)

    out = pl.pallas_call(
        kernel,
        out_shape=jax.ShapeDtypeStruct((B, C, HW_pad), out_dtype),
        grid_spec=pltpu.PrefetchScalarGridSpec(
            num_scalar_prefetch=0,
            grid=(B, nq, nk),
            in_specs=[
                pl.BlockSpec((1, tq, C), lambda b, qi, ki: (b, qi, 0)),       # x (Q tile)
                pl.BlockSpec((1, tkv, 2 * C), lambda b, qi, ki: (b, ki, 0)),  # K/V tile
                pl.BlockSpec((C, C), const),        # Wq (scale folded, (Cin, Cout))
                pl.BlockSpec((1, C), const),        # bq (scaled)
                pl.BlockSpec((C, C), const),        # Wp ((Cout, Cin))
                pl.BlockSpec((C, 1), const),        # bp
            ],
            out_specs=pl.BlockSpec((1, C, tq), lambda b, qi, ki: (b, 0, qi)),
            scratch_shapes=[
                pltpu.VMEM((tq, C), jnp.bfloat16),          # cached, pre-scaled Q
                pltpu.VMEM((tq, num_heads), jnp.float32),   # running max m (heads on lanes)
                pltpu.VMEM((tq, num_heads), jnp.float32),   # running sum l
                pltpu.VMEM((tq, C), jnp.float32),           # lane-dense accumulator
            ],
        ),
        compiler_params=pltpu.CompilerParams(
            dimension_semantics=("parallel", "parallel", "arbitrary"),
            vmem_limit_bytes=vmem_limit,
        ),
    )(x_tok, kv, wq_t, bq_r, wp_o, bp_c)

    if needs_mask:
        out = out[:, :, :HW]
    return out.reshape(B, C, H, W)


def attention_reference(x, params, num_heads):
    """Pure-JAX (f32) reimplementation of the PyTorch forward (NCHW), for validation."""
    B, C, H, W = x.shape
    hd = C // num_heads
    scale = hd ** (-0.5)
    wq, bq, wk, bk, wv, bv, wp, bp = params

    def conv1x1(t, w, b):
        return jnp.einsum('bchw,oc->bohw', t, w.reshape(C, C)) + b.reshape(1, C, 1, 1)

    q = conv1x1(x, wq, bq).reshape(B, num_heads, hd, H * W)
    q = q.reshape(B * num_heads, hd, H * W).transpose(0, 2, 1)
    k = conv1x1(x, wk, bk).reshape(B, num_heads, hd, H * W).reshape(B * num_heads, hd, H * W)
    v = conv1x1(x, wv, bv).reshape(B, num_heads, hd, H * W)
    v = v.reshape(B * num_heads, hd, H * W).transpose(0, 2, 1)

    attn = jax.nn.softmax((q * scale) @ k, axis=-1)
    o = (attn @ v).reshape(B, num_heads, H, W, hd).transpose(0, 1, 4, 2, 3).reshape(B, C, H, W)
    return conv1x1(o, wp, bp)


if __name__ == "__main__":
    num_heads = 4

    def make_case(case_key, B, C, H, W):
        keys = jax.random.split(case_key, 9)
        x = jax.random.normal(keys[0], (B, C, H, W), dtype=jnp.float32)
        conv_w = lambda k: 0.1 * jax.random.normal(k, (C, C, 1, 1), dtype=jnp.float32)
        conv_b = lambda k: 0.05 * jax.random.normal(k, (C,), dtype=jnp.float32)
        params = (conv_w(keys[1]), conv_b(keys[2]),   # query
                  conv_w(keys[3]), conv_b(keys[4]),   # key
                  conv_w(keys[5]), conv_b(keys[6]),   # value
                  conv_w(keys[7]), conv_b(keys[8]))   # proj
        return x, params

    key = jax.random.PRNGKey(0)
    k1, k2 = jax.random.split(key)

    # Case 1: B=2, C=32, 16x16 (HW=256); force 128 tiles so the demo exercises
    # the multi-tile online-softmax path (grid = (2, 2, 2)).
    x1, p1 = make_case(k1, 2, 32, 16, 16)
    out1 = jax.block_until_ready(attention_forward(x1, p1, num_heads, tq=128, tkv=128))
    ref1 = attention_reference(x1, p1, num_heads)
    assert out1.shape == ref1.shape
    err1 = float(jnp.max(jnp.abs(out1 - ref1)))
    assert jnp.allclose(out1, ref1, rtol=3e-2, atol=3e-2), \
        f"case1 mismatch vs reference (max abs err {err1})"

    # Case 2: H*W = 120 (not a multiple of 128) -> padded tokens + KV mask path.
    x2, p2 = make_case(k2, 1, 32, 10, 12)
    out2 = jax.block_until_ready(attention_forward(x2, p2, num_heads))
    ref2 = attention_reference(x2, p2, num_heads)
    assert out2.shape == ref2.shape
    err2 = float(jnp.max(jnp.abs(out2 - ref2)))
    assert jnp.allclose(out2, ref2, rtol=3e-2, atol=3e-2), \
        f"case2 mismatch vs reference (max abs err {err2})"

    print("KERNEL_OK")
</pallas_src>

<mosaic_0001>
module attributes {stable_mosaic.version = 11 : i64} {
  func.func @_kv_proj_kernel(%arg0: i32, %arg1: i32, %arg2: memref<1x128x32xbf16, #tpu.memory_space<vmem>>, %arg3: memref<32x64xbf16, #tpu.memory_space<vmem>>, %arg4: memref<1x64xf32, #tpu.memory_space<vmem>>, %arg5: memref<1x128x64xbf16, #tpu.memory_space<vmem>>) attributes {dimension_semantics = [#tpu.dimension_semantics<parallel>, #tpu.dimension_semantics<parallel>], iteration_bounds = array<i64: 2, 2>, scalar_prefetch = 0 : i64, scratch_operands = 0 : i64, tpu.core_type = #tpu.core_type<tc>, window_params = [{transform_indices = @transform_0, window_bounds = array<i64: 1, 128, 32>}, {pipeline_mode = #tpu.pipeline_mode<synchronous>, transform_indices = @transform_1, window_bounds = array<i64: 32, 64>}, {pipeline_mode = #tpu.pipeline_mode<synchronous>, transform_indices = @transform_2, window_bounds = array<i64: 1, 64>}, {transform_indices = @transform_3, window_bounds = array<i64: 1, 128, 64>}]} {
    %c0 = arith.constant 0 : index
    %c0_0 = arith.constant 0 : index
    %c0_1 = arith.constant 0 : index
    %0 = vector.load %arg2[%c0, %c0_0, %c0_1] : memref<1x128x32xbf16, #tpu.memory_space<vmem>>, vector<1x128x32xbf16>
    %1 = vector.shape_cast %0 : vector<1x128x32xbf16> to vector<128x32xbf16>
    %c0_2 = arith.constant 0 : index
    %c0_3 = arith.constant 0 : index
    %2 = vector.load %arg3[%c0_2, %c0_3] : memref<32x64xbf16, #tpu.memory_space<vmem>>, vector<32x64xbf16>
    %cst = arith.constant dense<0.000000e+00> : vector<128x64xf32>
    %3 = tpu.matmul %1, %2, %cst {dimension_numbers = #tpu.dot_dimension_numbers<[1], [0], [0], [1], [0, 0, 1, 1], [], []>} : vector<128x32xbf16>, vector<32x64xbf16>, vector<128x64xf32> -> vector<128x64xf32>
    %c0_4 = arith.constant 0 : index
    %c0_5 = arith.constant 0 : index
    %4 = vector.load %arg4[%c0_4, %c0_5] : memref<1x64xf32, #tpu.memory_space<vmem>>, vector<1x64xf32>
    %5 = vector.broadcast %4 : vector<1x64xf32> to vector<128x64xf32>
    %6 = arith.addf %3, %5 : vector<128x64xf32>
    %7 = arith.truncf %6 : vector<128x64xf32> to vector<128x64xbf16>
    %c0_6 = arith.constant 0 : index
    %c0_7 = arith.constant 0 : index
    %c0_8 = arith.constant 0 : index
    %8 = vector.load %arg5[%c0_6, %c0_7, %c0_8] : memref<1x128x64xbf16, #tpu.memory_space<vmem>>, vector<1x128x64xbf16>
    %9 = vector.shape_cast %8 : vector<1x128x64xbf16> to vector<128x64xbf16>
    %10 = vector.shape_cast %7 : vector<128x64xbf16> to vector<1x128x64xbf16>
    tpu.vector_store %arg5[%c0_6, %c0_7, %c0_8], %10 {strides = array<i32>} : memref<1x128x64xbf16, #tpu.memory_space<vmem>>, vector<1x128x64xbf16>,
    return
  }
  func.func @transform_0(%arg0: i32, %arg1: i32) -> (i32, i32, i32) {
    %c0_i32 = arith.constant 0 : i32
    %c0_i32_0 = arith.constant 0 : i32
    return %arg0, %arg1, %c0_i32 : i32, i32, i32
  }
  func.func @transform_1(%arg0: i32, %arg1: i32) -> (i32, i32) {
    %c0_i32 = arith.constant 0 : i32
    %c0_i32_0 = arith.constant 0 : i32
    %c0_i32_1 = arith.constant 0 : i32
    return %c0_i32, %c0_i32_0 : i32, i32
  }
  func.func @transform_2(%arg0: i32, %arg1: i32) -> (i32, i32) {
    %c0_i32 = arith.constant 0 : i32
    %c0_i32_0 = arith.constant 0 : i32
    %c0_i32_1 = arith.constant 0 : i32
    return %c0_i32, %c0_i32_0 : i32, i32
  }
  func.func @transform_3(%arg0: i32, %arg1: i32) -> (i32, i32, i32) {
    %c0_i32 = arith.constant 0 : i32
    %c0_i32_0 = arith.constant 0 : i32
    return %arg0, %arg1, %c0_i32 : i32, i32, i32
  }
}

</mosaic_0001>

<bundles_post_ra>
// kernel: tpu_custom_call.1
= control target key start
LH: loop header
LB: loop body
LE: loop exit
PB: predicated region body
PF: predicated region fallthrough
CT: control target
= control target key end

     0   :  { %s791_s12 = smov 0   ;;  %s793_s13 = smov 0   ;;  %s893_s0 = inlined_call_operand.vmem [shape: bf16[2,256,32], index: 0, kind: input, shape index: {}]   ;;  %s894_s1 = inlined_call_operand.vmem [shape: bf16[32,64], index: 1, kind: input, shape index: {}]   ;;  %s895_s2 = inlined_call_operand.vmem [shape: f32[1,64], index: 2, kind: input, shape index: {}]   ;;  %s896_s3 = inlined_call_operand.vmem [shape: bf16[2,256,64], index: 3, kind: output, shape index: {}]  }
   0x1   :  { %s795_s14 = smov 0   ;;  %s797_s15 = smov 0  }
   0x2   :  { %s799_s16 = smov 0  }
   0x3 LB: > { %s22_s17 = sadd.s32 1, %s761_s14  ;;  %s25_s18 = sadd.s32 1, %s765_s15  ;;  %s769_s16 = sphi %s799_s16, %s13_s16   ;;  %s765_s15 = sphi %s797_s15, %s900_s15   ;;  %s761_s14 = sphi %s795_s14, %s899_s14   ;;  %s757_s13 = sphi %s793_s13, %s898_s13   ;;  %s753_s12 = sphi %s791_s12, %s897_s12  }
   0x4   : > { %p23_p0 = scmp.ge.s32.totalorder %s22_s17, 2  ;;  %p587_p1 = scmp.ge.s32.totalorder %s769_s16, 1 }
   0x5   : > { %p158_p2 = scmp.lt.s32.totalorder %s769_s16, 5 }
   0x6   : > { %s902_s17 = smov (%p23_p0, %s22_s17), 0  ;;  %s904_s18 = smov (!%p23_p0, %s25_s18), %s765_s15 }
   0x7   : > { %p159_p3 = pnand %p587_p1, %p158_p2  ;;  %p27_p4 = scmp.ge.s32.totalorder %s904_s18, 2 }
   0x8   : > { %v721_v0 = vld [vmem:[%s894_s1] sm:$0xff] (!%p159_p3)   ;;  %s588_s21 = sshll.u32 (!%p159_p3), %s753_s12, 4  ;;  %v722_v1 = vld [vmem:[%s894_s1 + $0x8] sm:$0xff] (!%p159_p3)   ;;  %p191_p5 = scmp.lt.s32.totalorder (!%p159_p3), %s757_s13, 1  ;;  %vm290_vm0 = vcmask (!%p159_p3), 261120   ;;  %vm476_vm1 = vcmask (!%p159_p3), 519168  }
   0x9   : > { %s906_s18 = smov (%p27_p4, %s904_s18), 0  ;;  %162 = sbr.rel (%p159_p3) target bundleno = 252 (0xfc), region = 32 }
   0xa   : > { %657 = vmatprep.subr.bf16.mxu0 (!%p159_p3), %v721_v0  ;;  %677 = vmatprep.subr.bf16.mxu1 (!%p159_p3), %v721_v0  ;;  %p193_p6 = scmp.lt.s32.totalorder (!%p159_p3), %s588_s21, 31  ;;  %v594_v10 = vld [vmem:[%s895_s2] ss:$0 sm:$0xff] (!%p159_p3) }
   0xb   : > { %658 = vmatpush3.bf16.msra.mxu0 (!%p159_p3), %v721_v0  ;;  %679 = vmatpush3.bf16.msra.mxu1 (!%p159_p3), %v721_v0 }
   0xc   : > { %659 = vmatprep.subr.bf16.mxu0 (!%p159_p3), %v722_v1  ;;  %678 = vmatprep.subr.bf16.mxu1 (!%p159_p3), %v722_v1 }
   0xf   : > { %660 = vmatpush3.bf16.msra.mxu0 (!%p159_p3), %v722_v1  ;;  %680 = vmatpush3.bf16.msra.mxu1 (!%p159_p3), %v722_v1 }
  0x10   : > { %s908_s13 = smov (!%p191_p5, %s757_s13), 1  ;;  %s910_s21 = smov (!%p193_p6, %s588_s21), 31 }
  0x11   : > { %s589_s24 = sshll.u32 %s908_s13, 5 }
  0x12   : > { %s196_s25 = sadd.s32 %s589_s24, %s910_s21 }
  0x13   : > { %s590_s26 = sshll.u32 %s196_s25, 2 }
  0x14   : > { %s198_s29 = scalar_lea.vmem %s893_s0, %s590_s26  ;;  %s844_s7 = scalar_lea.vmem %s896_s3, %s590_s26 }
  0x15   : > { %v723_v2 = vld [vmem:[%s198_s29] sm:$0xff]   ;;  %v725_v4 = vld [vmem:[%s198_s29 + $0x8] sm:$0xff]   ;;  %v727_v6 = vld [vmem:[%s198_s29 + $0x10] sm:$0xff]  }
  0x16   : > { %v724_v3 = vld [vmem:[%s198_s29 + $0x20] sm:$0xff]   ;;  %661 = vmatprep.mubr.msk.bf16.mxu0 %vm290_vm0, %v723_v2  ;;  %v726_v5 = vld [vmem:[%s198_s29 + $0x28] sm:$0xff]   ;;  %v728_v7 = vld [vmem:[%s198_s29 + $0x30] sm:$0xff]  }
  0x17   : > { %669 = vmatprep.mubr.msk.bf16.mxu1 %vm290_vm0, %v724_v3  ;;  %662 = vmatmul.mubr.msk.bf16.vlgmr.msra.gmra.mrb[0].mxu0 %vm290_vm0, %v725_v4  ;;  %v729_v8 = vld [vmem:[%s198_s29 + $0x18] sm:$0xff]  }
  0x18   : > { %670 = vmatmul.mubr.msk.bf16.vlgmr.msra.gmra.mrb[0].mxu1 %vm290_vm0, %v726_v5  ;;  %665 = vmatprep.mubr.msk.bf16.mxu0 %vm290_vm0, %v727_v6  ;;  %v730_v9 = vld [vmem:[%s198_s29 + $0x38] sm:$0xff]  }
  0x19   : > { %673 = vmatprep.mubr.msk.bf16.mxu1 %vm290_vm0, %v728_v7 }
  0x1f   : > { %666 = vmatmul.mubr.msk.bf16.gmra.mrb[4].mxu0 %vm290_vm0, %v729_v8 }
  0x20   : > { %674 = vmatmul.mubr.msk.bf16.gmra.mrb[4].mxu1 %vm290_vm0, %v730_v9 }
  0xea   : > { %v663_v11 = vpop.f32.mrb[0].mxu0 }
  0xeb   : > { %v358_v12 = vadd.f32 %v663_v11, %v594_v10  ;;  %v671_v13 = vpop.f32.mrb[0].mxu1  ;;  %v349_v14 = vpop.f32.mrb[1].mxu0 }
  0xec   : > { %v390_v15 = vadd.f32 %v671_v13, %v594_v10  ;;  %v350_v16 = vadd.f32 %v594_v10, %v349_v14  ;;  %v381_v17 = vpop.f32.mrb[1].mxu1  ;;  %v664_v18 = vpop.f32.mrb[2].mxu0 }
  0xed   : > { %v633_v19 = vpack.c.bf16 %v358_v12, %v358_v12  ;;  %v382_v20 = vadd.f32 %v594_v10, %v381_v17  ;;  %v361_v21 = vadd.f32 %v664_v18, %v594_v10  ;;  %v672_v22 = vpop.f32.mrb[2].mxu1  ;;  %v352_v23 = vpop.f32.mrb[3].mxu0 }
  0xee   : > { %v641_v24 = vpack.c.bf16 %v390_v15, %v390_v15  ;;  %v631_v25 = vpack.c.bf16 %v350_v16, %v350_v16  ;;  %v393_v26 = vadd.f32 %v672_v22, %v594_v10  ;;  %v353_v27 = vadd.f32 %v594_v10, %v352_v23  ;;  %v384_v28 = vpop.f32.mrb[3].mxu1 }
  0xef   : > { %479 = vst.msk [vmem:[%s844_s7 + $0x8] sm:$0xf] %vm476_vm1, %v633_v19  ;;  %v639_v29 = vpack.c.bf16 %v382_v20, %v382_v20  ;;  %v634_v30 = vpack.c.bf16 %v361_v21, %v361_v21  ;;  %v385_v31 = vadd.f32 %v594_v10, %v384_v28 }
  0xf0   : > { %487 = vst.msk [vmem:[%s844_s7 + $0x28] sm:$0xf] %vm476_vm1, %v641_v24  ;;  %477 = vst.msk [vmem:[%s844_s7] sm:$0xf] %vm476_vm1, %v631_v25  ;;  %v642_v32 = vpack.c.bf16 %v393_v26, %v393_v26  ;;  %v632_v33 = vpack.c.bf16 %v353_v27, %v353_v27 }
  0xf1   : > { %485 = vst.msk [vmem:[%s844_s7 + $0x20] sm:$0xf] %vm476_vm1, %v639_v29  ;;  %480 = vst.msk [vmem:[%s844_s7 + $0xc] sm:$0xf] %vm476_vm1, %v634_v30  ;;  %v640_v34 = vpack.c.bf16 %v385_v31, %v385_v31 }
  0xf2   : > { %488 = vst.msk [vmem:[%s844_s7 + $0x2c] sm:$0xf] %vm476_vm1, %v642_v32  ;;  %478 = vst.msk [vmem:[%s844_s7 + $0x4] sm:$0xf] %vm476_vm1, %v632_v33  ;;  %v667_v35 = vpop.f32.mrb[4].mxu0 }
  0xf3   : > { %486 = vst.msk [vmem:[%s844_s7 + $0x24] sm:$0xf] %vm476_vm1, %v640_v34  ;;  %v374_v36 = vadd.f32 %v667_v35, %v594_v10  ;;  %v675_v37 = vpop.f32.mrb[4].mxu1  ;;  %v365_v38 = vpop.f32.mrb[5].mxu0 }
  0xf4   : > { %v406_v39 = vadd.f32 %v675_v37, %v594_v10  ;;  %v366_v40 = vadd.f32 %v594_v10, %v365_v38  ;;  %v397_v41 = vpop.f32.mrb[5].mxu1  ;;  %v668_v42 = vpop.f32.mrb[6].mxu0 }
  0xf5   : > { %v637_v43 = vpack.c.bf16 %v374_v36, %v374_v36  ;;  %v398_v44 = vadd.f32 %v594_v10, %v397_v41  ;;  %v377_v45 = vadd.f32 %v668_v42, %v594_v10  ;;  %v676_v46 = vpop.f32.mrb[6].mxu1  ;;  %v368_v47 = vpop.f32.mrb[7].mxu0 }
  0xf6   : > { %v645_v48 = vpack.c.bf16 %v406_v39, %v406_v39  ;;  %v635_v49 = vpack.c.bf16 %v366_v40, %v366_v40  ;;  %v409_v50 = vadd.f32 %v676_v46, %v594_v10  ;;  %v369_v51 = vadd.f32 %v594_v10, %v368_v47  ;;  %v400_v52 = vpop.f32.mrb[7].mxu1 }
  0xf7   : > { %483 = vst.msk [vmem:[%s844_s7 + $0x18] sm:$0xf] %vm476_vm1, %v637_v43  ;;  %v643_v53 = vpack.c.bf16 %v398_v44, %v398_v44  ;;  %v638_v54 = vpack.c.bf16 %v377_v45, %v377_v45  ;;  %v401_v55 = vadd.f32 %v594_v10, %v400_v52 }
  0xf8   : > { %491 = vst.msk [vmem:[%s844_s7 + $0x38] sm:$0xf] %vm476_vm1, %v645_v48  ;;  %481 = vst.msk [vmem:[%s844_s7 + $0x10] sm:$0xf] %vm476_vm1, %v635_v49  ;;  %v646_v56 = vpack.c.bf16 %v409_v50, %v409_v50  ;;  %v636_v57 = vpack.c.bf16 %v369_v51, %v369_v51 }
  0xf9   : > { %489 = vst.msk [vmem:[%s844_s7 + $0x30] sm:$0xf] %vm476_vm1, %v643_v53  ;;  %484 = vst.msk [vmem:[%s844_s7 + $0x1c] sm:$0xf] %vm476_vm1, %v638_v54  ;;  %v644_v58 = vpack.c.bf16 %v401_v55, %v401_v55 }
  0xfa   : > { %492 = vst.msk [vmem:[%s844_s7 + $0x3c] sm:$0xf] %vm476_vm1, %v646_v56  ;;  %482 = vst.msk [vmem:[%s844_s7 + $0x14] sm:$0xf] %vm476_vm1, %v636_v57 }
  0xfb   : > { %490 = vst.msk [vmem:[%s844_s7 + $0x34] sm:$0xf] %vm476_vm1, %v644_v58 }
  0xfc PF: > { %s13_s16 = sadd.s32 1, %s769_s16   ;;  %s897_s12 = smov %s761_s14 }
  0xfd   : > { %p10_p7 = scmp.ge.s32.totalorder %s13_s16, 6   ;;  %s898_s13 = smov %s765_s15 }
  0xfe   : > { %s899_s14 = smov %s902_s17  ;;  %s900_s15 = smov %s906_s18 }
  0xff   :  { %12 = sbr.rel (!%p10_p7) target bundleno = 3 (0x3), region = 62 }

</bundles_post_ra>
